<compile_context>
chip_gen: v7x
topology: tpu7x:2x2x1
jax: 0.10.0
libtpu: 0.0.40
codegen_flags: <defaults>
</compile_context>

<pallas_src>
import functools

import jax
import jax.numpy as jnp
from jax.experimental import pallas as pl
from jax.experimental.pallas import tpu as pltpu


def _round_up(x, m):
    return (x + m - 1) // m * m


def _lane_tile(m, max_tile=2048):
    """Lane-dim tile (multiple of 128) and the padded extent it implies.

    One maximal tile at small M (fewest per-grid-step overheads on single-TC v5e/v6e);
    once M exceeds max_tile the grid has >=2 tiles and the "parallel" axis lets v7x's
    two TensorCores split them.  Per-step VMEM is ~n_cand * KKC_aug * tm * 2B
    (double-buffered bf16), far below the 32 MiB scoped default on all generations.
    """
    tm = min(max_tile, _round_up(m, 128))
    return tm, _round_up(m, tm)


# ----------------------------- Pallas kernel -----------------------------

def _conv_pool_act_kernel(n_cand, act, w_ref, x_ref, o_ref):
    """Fused conv-as-matmul (+ optional 2x2 maxpool over candidates) + activation.

    w_ref: (Cout_pad, KKC_aug) bf16 -- conv weights with the bias folded into column
           `kkc` (matched by an all-ones row in the patches).
    x_ref: (n_cand, KKC_aug, TM) bf16 -- one im2col patch slab per pooling-window
           candidate (n_cand=4 for conv+maxpool stages, 1 for plain conv).
    o_ref: (Cout_pad, TM) -- lane-dense output tile (bf16 intermediates, f32 outputs).
    """
    w = w_ref[...]
    acc = jnp.dot(w, x_ref[0], preferred_element_type=jnp.float32)
    for d in range(1, n_cand):
        cand = jnp.dot(w, x_ref[d], preferred_element_type=jnp.float32)
        acc = jnp.maximum(acc, cand)                 # 2x2 maxpool reduced on the VPU
    if act == "relu":
        acc = jnp.maximum(acc, 0.0)
    elif act == "sigmoid":
        acc = 0.5 * (jnp.tanh(0.5 * acc) + 1.0)      # stable sigmoid; tanh runs on the EUP
    o_ref[...] = acc.astype(o_ref.dtype)


# ----------------------------- host-side layout glue -----------------------------

def _im2col(xp, k, row_starts, col_starts, cin):
    """Extract KxK conv patches at the given output positions from padded NHWC input.

    Returns (K*K*Cin, N*R*S) with row order (kh, kw, cin) and column order (n, r, s),
    already transposed so the conv matmul's output tile is lane-dense over (n, r, s).
    """
    n = xp.shape[0]
    r, s = row_starts.shape[0], col_starts.shape[0]
    ri = (row_starts[:, None] + jnp.arange(k)[None, :]).reshape(-1)   # (R*K,)
    ci = (col_starts[:, None] + jnp.arange(k)[None, :]).reshape(-1)   # (S*K,)
    g = jnp.take(xp, ri, axis=1)
    g = jnp.take(g, ci, axis=2)                                       # (N, R*K, S*K, C)
    g = g.reshape(n, r, k, s, k, cin)
    g = jnp.transpose(g, (2, 4, 5, 0, 1, 3))                          # (K, K, C, N, R, S)
    return g.reshape(k * k * cin, n * r * s)


def _conv_block(x_nhwc, w_aug, *, cout, cin, k, pad, pool, act, out_dtype):
    """stride-1 conv (cross-correlation, like nn.Conv2d) as one lane-dense matmul
    pallas_call, optionally fused with MaxPool2d(2, stride=2, padding=1) + activation.

    The pool is fused by building one im2col slab per pool-window candidate
    (dh, dw) in {0,1}^2 at conv position clip(2p - 1 + d, 0, conv_out - 1); clipped
    (out-of-range, implicitly -inf padded) candidates duplicate an in-range value of
    the same window, so the in-kernel max is exact.
    """
    n, h, wid, c = x_nhwc.shape
    assert c == cin
    oh = h + 2 * pad - k + 1
    ow = wid + 2 * pad - k + 1
    xp = jnp.pad(x_nhwc, ((0, 0), (pad, pad), (pad, pad), (0, 0)))

    if pool:
        assert oh % 2 == 0 and ow % 2 == 0  # matches nn.MaxPool2d output formula here
        rh, rw = oh // 2 + 1, ow // 2 + 1
        slabs = []
        for dh in (0, 1):
            for dw in (0, 1):
                rs = jnp.clip(2 * jnp.arange(rh) - 1 + dh, 0, oh - 1)
                cs = jnp.clip(2 * jnp.arange(rw) - 1 + dw, 0, ow - 1)
                slabs.append(_im2col(xp, k, rs, cs, cin))
        patches = jnp.stack(slabs, axis=0)                            # (4, KKC, M)
    else:
        rh, rw = oh, ow
        patches = _im2col(xp, k, jnp.arange(oh), jnp.arange(ow), cin)[None]  # (1, KKC, M)

    m = n * rh * rw
    kkc = k * k * cin
    cout_pad, kkc_aug = w_aug.shape
    n_cand = patches.shape[0]
    tm, m_pad = _lane_tile(m)

    patches = jnp.pad(patches, ((0, 0), (0, kkc_aug - kkc), (0, m_pad - m)))
    patches = patches.at[:, kkc, :].set(1.0)          # all-ones bias row (matches w_aug)
    patches = patches.astype(jnp.bfloat16)            # bf16 MXU operands, f32 accumulation

    out = pl.pallas_call(
        functools.partial(_conv_pool_act_kernel, n_cand, act),
        out_shape=jax.ShapeDtypeStruct((cout_pad, m_pad), out_dtype),
        grid=(m_pad // tm,),
        in_specs=[
            pl.BlockSpec((cout_pad, kkc_aug), lambda i: (0, 0)),       # weights stay resident
            pl.BlockSpec((n_cand, kkc_aug, tm), lambda i: (0, 0, i)),  # M-tile of patch slabs
        ],
        out_specs=pl.BlockSpec((cout_pad, tm), lambda i: (0, i)),
        compiler_params=pltpu.CompilerParams(
            # shards M tiles across v7x's two TensorCores when M is large; no-op on 1-TC chips
            dimension_semantics=("parallel",)),
    )(w_aug, patches)

    out = out[:cout, :m]                               # strip sublane / lane padding
    return jnp.transpose(out, (1, 0)).reshape(n, rh, rw, cout)


def upsample_nearest_2x(x_nhwc):
    return jnp.repeat(jnp.repeat(x_nhwc, 2, axis=1), 2, axis=2)


# ----------------------------- params / prepacking -----------------------------

def init_params(key):
    """Same layer shapes as the PyTorch module (uniform +-1/sqrt(fan_in) init)."""
    def uinit(k, w_shape, fan_in, n_bias):
        bound = 1.0 / jnp.sqrt(fan_in)
        kw, kb = jax.random.split(k)
        w = jax.random.uniform(kw, w_shape, jnp.float32, -bound, bound)
        b = jax.random.uniform(kb, (n_bias,), jnp.float32, -bound, bound)
        return w, b

    k1, k2, k3, k4 = jax.random.split(key, 4)
    enc_w1, enc_b1 = uinit(k1, (9, 3, 5, 5), 3 * 25, 9)   # Conv2d(3, 9, 5, padding=1)
    enc_w2, enc_b2 = uinit(k2, (3, 9, 5, 5), 9 * 25, 3)   # Conv2d(9, 3, 5, padding=1)
    dec_w1, dec_b1 = uinit(k3, (3, 9, 5, 5), 9 * 25, 9)   # ConvTranspose2d(3, 9, 5, padding=2)
    dec_w2, dec_b2 = uinit(k4, (9, 3, 5, 5), 3 * 25, 3)   # ConvTranspose2d(9, 3, 5, padding=2)
    return dict(enc_w1=enc_w1, enc_b1=enc_b1, enc_w2=enc_w2, enc_b2=enc_b2,
                dec_w1=dec_w1, dec_b1=dec_b1, dec_w2=dec_w2, dec_b2=dec_b2)


def prepack_params(params):
    """One-time weight packing hoisted out of the jitted forward:
      * ConvTranspose2d weights -> equivalent Conv2d weights (spatial flip + in/out swap;
        exact for stride=1, with conv padding K-1-p = 2 here),
      * reshape to (Cout, K*K*Cin) matching the im2col row order (kh, kw, cin),
      * bias folded in as an extra column (matched by an all-ones patch row),
      * padded to 16-aligned bf16-friendly extents and cast to bf16.
    """
    def pack(w_pt, b, transpose):
        if transpose:
            w_pt = jnp.transpose(jnp.flip(w_pt, axis=(2, 3)), (1, 0, 2, 3))
        cout, cin, k, _ = w_pt.shape
        kkc = k * k * cin
        cout_pad = _round_up(cout, 16)
        kkc_aug = _round_up(kkc + 1, 16)
        w_mat = jnp.transpose(w_pt, (0, 2, 3, 1)).reshape(cout, kkc)  # (Cout, kh*kw*cin)
        w_aug = jnp.zeros((cout_pad, kkc_aug), jnp.float32)
        w_aug = w_aug.at[:cout, :kkc].set(w_mat)
        w_aug = w_aug.at[:cout, kkc].set(b)                           # folded bias column
        return w_aug.astype(jnp.bfloat16)

    return {
        "enc1": pack(params["enc_w1"], params["enc_b1"], False),
        "enc2": pack(params["enc_w2"], params["enc_b2"], False),
        "dec1": pack(params["dec_w1"], params["dec_b1"], True),
        "dec2": pack(params["dec_w2"], params["dec_b2"], True),
    }


# ----------------------------- model forward -----------------------------

def wikiart_part2_forward(x_nchw, w, decode_only=False):
    """Forward pass of WikiArtPart2. `w` is the prepacked-weight dict (prepack_params)."""
    x = jnp.transpose(x_nchw, (0, 2, 3, 1)).astype(jnp.bfloat16)  # NCHW -> NHWC

    def encoder(x):
        # Conv2d(3,9,5,p=1) -> MaxPool(2,2,p=1) -> ReLU   (pool + ReLU fused into the kernel;
        # ReLU commutes with max, so relu(maxpool(y)) == fused max+relu epilogue)
        x = _conv_block(x, w["enc1"], cout=9, cin=3, k=5, pad=1, pool=True,
                        act="relu", out_dtype=jnp.bfloat16)
        # Conv2d(9,3,5,p=1) -> MaxPool(2,2,p=1)           (encoded output kept f32)
        x = _conv_block(x, w["enc2"], cout=3, cin=9, k=5, pad=1, pool=True,
                        act=None, out_dtype=jnp.float32)
        return x

    def decoder(x):
        # ConvTranspose2d(3,9,5,p=2) -> Upsample(2) -> ReLU.  ConvT == conv with the
        # prepacked flipped kernel and conv pad K-1-p = 2; ReLU/Sigmoid commute with
        # nearest upsample so they are fused into the conv kernels.
        x = _conv_block(x, w["dec1"], cout=9, cin=3, k=5, pad=2, pool=False,
                        act="relu", out_dtype=jnp.bfloat16)
        x = upsample_nearest_2x(x)
        # ConvTranspose2d(9,3,5,p=2) -> Upsample(2) -> Sigmoid
        x = _conv_block(x, w["dec2"], cout=3, cin=9, k=5, pad=2, pool=False,
                        act="sigmoid", out_dtype=jnp.float32)
        x = upsample_nearest_2x(x)
        return x

    if decode_only:
        return jnp.transpose(decoder(x), (0, 3, 1, 2))
    enc = encoder(x)
    dec = decoder(enc.astype(jnp.bfloat16))
    return (jnp.transpose(enc, (0, 3, 1, 2)),   # (N, 3, 4, 4) for 16x16 input
            jnp.transpose(dec, (0, 3, 1, 2)))   # (N, 3, 16, 16)


# ----------------------------- pure-JAX f32 reference -----------------------------

def _ref_forward(x_nchw, params):
    dn = ("NCHW", "OIHW", "NCHW")

    def conv(x, w, b, pad):
        y = jax.lax.conv_general_dilated(x, w, (1, 1), [(pad, pad), (pad, pad)],
                                         dimension_numbers=dn)
        return y + b[None, :, None, None]

    def convT(x, w, b, pad):
        k = w.shape[2]
        wf = jnp.transpose(jnp.flip(w, axis=(2, 3)), (1, 0, 2, 3))
        return conv(x, wf, b, k - 1 - pad)

    def maxpool(x):
        return jax.lax.reduce_window(x, -jnp.inf, jax.lax.max,
                                     (1, 1, 2, 2), (1, 1, 2, 2),
                                     [(0, 0), (0, 0), (1, 1), (1, 1)])

    def up2(x):
        return jnp.repeat(jnp.repeat(x, 2, axis=2), 2, axis=3)

    e = conv(x_nchw, params["enc_w1"], params["enc_b1"], 1)
    e = jax.nn.relu(maxpool(e))
    e = conv(e, params["enc_w2"], params["enc_b2"], 1)
    e = maxpool(e)
    d = convT(e, params["dec_w1"], params["dec_b1"], 2)
    d = jax.nn.relu(up2(d))
    d = convT(d, params["dec_w2"], params["dec_b2"], 2)
    d = jax.nn.sigmoid(up2(d))
    return e, d


if __name__ == "__main__":
    key = jax.random.PRNGKey(0)
    pkey, xkey = jax.random.split(key)
    params = init_params(pkey)
    packed = prepack_params(params)   # one-time weight prepack (hoisted out of the forward)

    x = jax.random.normal(xkey, (2, 3, 16, 16), dtype=jnp.float32)  # NCHW like PyTorch

    fwd = jax.jit(functools.partial(wikiart_part2_forward, decode_only=False))
    encoded, decoded = fwd(x, packed)
    jax.block_until_ready((encoded, decoded))

    assert encoded.shape == (2, 3, 4, 4), encoded.shape
    assert decoded.shape == (2, 3, 16, 16), decoded.shape
    assert bool(jnp.all(jnp.isfinite(encoded))) and bool(jnp.all(jnp.isfinite(decoded)))
    assert bool(jnp.all(decoded >= 0.0)) and bool(jnp.all(decoded <= 1.0))

    # decode_only path (module API parity)
    dec_only = jax.jit(functools.partial(wikiart_part2_forward, decode_only=True))(encoded, packed)
    jax.block_until_ready(dec_only)
    assert dec_only.shape == (2, 3, 16, 16), dec_only.shape

    # Tolerance check vs. a pure-JAX f32 reference (bf16 MXU operands -> ~1e-2 level error).
    enc_ref, dec_ref = _ref_forward(x, params)
    assert float(jnp.max(jnp.abs(encoded - enc_ref))) < 0.08
    assert float(jnp.max(jnp.abs(decoded - dec_ref))) < 0.08

    print("KERNEL_OK")
</pallas_src>

<mosaic_0001>
module attributes {stable_mosaic.version = 11 : i64} {
  func.func @_conv_pool_act_kernel(%arg0: i32, %arg1: memref<16x80xbf16, #tpu.memory_space<vmem>>, %arg2: memref<4x80x128xbf16, #tpu.memory_space<vmem>>, %arg3: memref<16x128xbf16, #tpu.memory_space<vmem>>) attributes {dimension_semantics = [#tpu.dimension_semantics<parallel>], iteration_bounds = array<i64: 1>, scalar_prefetch = 0 : i64, scratch_operands = 0 : i64, tpu.core_type = #tpu.core_type<tc>, window_params = [{pipeline_mode = #tpu.pipeline_mode<synchronous>, transform_indices = @transform_0, window_bounds = array<i64: 16, 80>}, {transform_indices = @transform_1, window_bounds = array<i64: 4, 80, 128>}, {transform_indices = @transform_2, window_bounds = array<i64: 16, 128>}]} {
    %c0 = arith.constant 0 : index
    %c0_0 = arith.constant 0 : index
    %0 = vector.load %arg1[%c0, %c0_0] : memref<16x80xbf16, #tpu.memory_space<vmem>>, vector<16x80xbf16>
    %c0_1 = arith.constant 0 : index
    %c0_2 = arith.constant 0 : index
    %c0_3 = arith.constant 0 : index
    %1 = vector.load %arg2[%c0_1, %c0_2, %c0_3] : memref<4x80x128xbf16, #tpu.memory_space<vmem>>, vector<1x80x128xbf16>
    %2 = vector.shape_cast %1 : vector<1x80x128xbf16> to vector<80x128xbf16>
    %cst = arith.constant dense<0.000000e+00> : vector<16x128xf32>
    %3 = tpu.matmul %0, %2, %cst {dimension_numbers = #tpu.dot_dimension_numbers<[1], [0], [0], [1], [0, 0, 1, 1], [], []>} : vector<16x80xbf16>, vector<80x128xbf16>, vector<16x128xf32> -> vector<16x128xf32>
    %c1 = arith.constant 1 : index
    %c0_4 = arith.constant 0 : index
    %c0_5 = arith.constant 0 : index
    %4 = vector.load %arg2[%c1, %c0_4, %c0_5] : memref<4x80x128xbf16, #tpu.memory_space<vmem>>, vector<1x80x128xbf16>
    %5 = vector.shape_cast %4 : vector<1x80x128xbf16> to vector<80x128xbf16>
    %cst_6 = arith.constant dense<0.000000e+00> : vector<16x128xf32>
    %6 = tpu.matmul %0, %5, %cst_6 {dimension_numbers = #tpu.dot_dimension_numbers<[1], [0], [0], [1], [0, 0, 1, 1], [], []>} : vector<16x80xbf16>, vector<80x128xbf16>, vector<16x128xf32> -> vector<16x128xf32>
    %7 = arith.maximumf %3, %6 : vector<16x128xf32>
    %c2 = arith.constant 2 : index
    %c0_7 = arith.constant 0 : index
    %c0_8 = arith.constant 0 : index
    %8 = vector.load %arg2[%c2, %c0_7, %c0_8] : memref<4x80x128xbf16, #tpu.memory_space<vmem>>, vector<1x80x128xbf16>
    %9 = vector.shape_cast %8 : vector<1x80x128xbf16> to vector<80x128xbf16>
    %cst_9 = arith.constant dense<0.000000e+00> : vector<16x128xf32>
    %10 = tpu.matmul %0, %9, %cst_9 {dimension_numbers = #tpu.dot_dimension_numbers<[1], [0], [0], [1], [0, 0, 1, 1], [], []>} : vector<16x80xbf16>, vector<80x128xbf16>, vector<16x128xf32> -> vector<16x128xf32>
    %11 = arith.maximumf %7, %10 : vector<16x128xf32>
    %c3 = arith.constant 3 : index
    %c0_10 = arith.constant 0 : index
    %c0_11 = arith.constant 0 : index
    %12 = vector.load %arg2[%c3, %c0_10, %c0_11] : memref<4x80x128xbf16, #tpu.memory_space<vmem>>, vector<1x80x128xbf16>
    %13 = vector.shape_cast %12 : vector<1x80x128xbf16> to vector<80x128xbf16>
    %cst_12 = arith.constant dense<0.000000e+00> : vector<16x128xf32>
    %14 = tpu.matmul %0, %13, %cst_12 {dimension_numbers = #tpu.dot_dimension_numbers<[1], [0], [0], [1], [0, 0, 1, 1], [], []>} : vector<16x80xbf16>, vector<80x128xbf16>, vector<16x128xf32> -> vector<16x128xf32>
    %15 = arith.maximumf %11, %14 : vector<16x128xf32>
    %cst_13 = arith.constant 0.000000e+00 : f32
    %16 = vector.broadcast %cst_13 : f32 to vector<16x128xf32>
    %17 = arith.maximumf %15, %16 : vector<16x128xf32>
    %18 = arith.truncf %17 : vector<16x128xf32> to vector<16x128xbf16>
    %c0_14 = arith.constant 0 : index
    %c0_15 = arith.constant 0 : index
    %19 = vector.load %arg3[%c0_14, %c0_15] : memref<16x128xbf16, #tpu.memory_space<vmem>>, vector<16x128xbf16>
    tpu.vector_store %arg3[%c0_14, %c0_15], %18 {strides = array<i32>} : memref<16x128xbf16, #tpu.memory_space<vmem>>, vector<16x128xbf16>,
    return
  }
  func.func @transform_0(%arg0: i32) -> (i32, i32) {
    %c0_i32 = arith.constant 0 : i32
    %c0_i32_0 = arith.constant 0 : i32
    %c0_i32_1 = arith.constant 0 : i32
    return %c0_i32, %c0_i32_0 : i32, i32
  }
  func.func @transform_1(%arg0: i32) -> (i32, i32, i32) {
    %c0_i32 = arith.constant 0 : i32
    %c0_i32_0 = arith.constant 0 : i32
    %c0_i32_1 = arith.constant 0 : i32
    return %c0_i32, %c0_i32_0, %arg0 : i32, i32, i32
  }
  func.func @transform_2(%arg0: i32) -> (i32, i32) {
    %c0_i32 = arith.constant 0 : i32
    %c0_i32_0 = arith.constant 0 : i32
    return %c0_i32, %arg0 : i32, i32
  }
}

module attributes {stable_mosaic.version = 11 : i64} {
  func.func @_conv_pool_act_kernel(%arg0: i32, %arg1: memref<16x240xbf16, #tpu.memory_space<vmem>>, %arg2: memref<4x240x128xbf16, #tpu.memory_space<vmem>>, %arg3: memref<16x128xf32, #tpu.memory_space<vmem>>) attributes {dimension_semantics = [#tpu.dimension_semantics<parallel>], iteration_bounds = array<i64: 1>, scalar_prefetch = 0 : i64, scratch_operands = 0 : i64, tpu.core_type = #tpu.core_type<tc>, window_params = [{pipeline_mode = #tpu.pipeline_mode<synchronous>, transform_indices = @transform_0, window_bounds = array<i64: 16, 240>}, {transform_indices = @transform_1, window_bounds = array<i64: 4, 240, 128>}, {transform_indices = @transform_2, window_bounds = array<i64: 16, 128>}]} {
    %c0 = arith.constant 0 : index
    %c0_0 = arith.constant 0 : index
    %0 = vector.load %arg1[%c0, %c0_0] : memref<16x240xbf16, #tpu.memory_space<vmem>>, vector<16x240xbf16>
    %c0_1 = arith.constant 0 : index
    %c0_2 = arith.constant 0 : index
    %c0_3 = arith.constant 0 : index
    %1 = vector.load %arg2[%c0_1, %c0_2, %c0_3] : memref<4x240x128xbf16, #tpu.memory_space<vmem>>, vector<1x240x128xbf16>
    %2 = vector.shape_cast %1 : vector<1x240x128xbf16> to vector<240x128xbf16>
    %cst = arith.constant dense<0.000000e+00> : vector<16x128xf32>
    %3 = tpu.matmul %0, %2, %cst {dimension_numbers = #tpu.dot_dimension_numbers<[1], [0], [0], [1], [0, 0, 1, 1], [], []>} : vector<16x240xbf16>, vector<240x128xbf16>, vector<16x128xf32> -> vector<16x128xf32>
    %c1 = arith.constant 1 : index
    %c0_4 = arith.constant 0 : index
    %c0_5 = arith.constant 0 : index
    %4 = vector.load %arg2[%c1, %c0_4, %c0_5] : memref<4x240x128xbf16, #tpu.memory_space<vmem>>, vector<1x240x128xbf16>
    %5 = vector.shape_cast %4 : vector<1x240x128xbf16> to vector<240x128xbf16>
    %cst_6 = arith.constant dense<0.000000e+00> : vector<16x128xf32>
    %6 = tpu.matmul %0, %5, %cst_6 {dimension_numbers = #tpu.dot_dimension_numbers<[1], [0], [0], [1], [0, 0, 1, 1], [], []>} : vector<16x240xbf16>, vector<240x128xbf16>, vector<16x128xf32> -> vector<16x128xf32>
    %7 = arith.maximumf %3, %6 : vector<16x128xf32>
    %c2 = arith.constant 2 : index
    %c0_7 = arith.constant 0 : index
    %c0_8 = arith.constant 0 : index
    %8 = vector.load %arg2[%c2, %c0_7, %c0_8] : memref<4x240x128xbf16, #tpu.memory_space<vmem>>, vector<1x240x128xbf16>
    %9 = vector.shape_cast %8 : vector<1x240x128xbf16> to vector<240x128xbf16>
    %cst_9 = arith.constant dense<0.000000e+00> : vector<16x128xf32>
    %10 = tpu.matmul %0, %9, %cst_9 {dimension_numbers = #tpu.dot_dimension_numbers<[1], [0], [0], [1], [0, 0, 1, 1], [], []>} : vector<16x240xbf16>, vector<240x128xbf16>, vector<16x128xf32> -> vector<16x128xf32>
    %11 = arith.maximumf %7, %10 : vector<16x128xf32>
    %c3 = arith.constant 3 : index
    %c0_10 = arith.constant 0 : index
    %c0_11 = arith.constant 0 : index
    %12 = vector.load %arg2[%c3, %c0_10, %c0_11] : memref<4x240x128xbf16, #tpu.memory_space<vmem>>, vector<1x240x128xbf16>
    %13 = vector.shape_cast %12 : vector<1x240x128xbf16> to vector<240x128xbf16>
    %cst_12 = arith.constant dense<0.000000e+00> : vector<16x128xf32>
    %14 = tpu.matmul %0, %13, %cst_12 {dimension_numbers = #tpu.dot_dimension_numbers<[1], [0], [0], [1], [0, 0, 1, 1], [], []>} : vector<16x240xbf16>, vector<240x128xbf16>, vector<16x128xf32> -> vector<16x128xf32>
    %15 = arith.maximumf %11, %14 : vector<16x128xf32>
    %c0_13 = arith.constant 0 : index
    %c0_14 = arith.constant 0 : index
    %16 = vector.load %arg3[%c0_13, %c0_14] : memref<16x128xf32, #tpu.memory_space<vmem>>, vector<16x128xf32>
    tpu.vector_store %arg3[%c0_13, %c0_14], %15 {strides = array<i32>} : memref<16x128xf32, #tpu.memory_space<vmem>>, vector<16x128xf32>,
    return
  }
  func.func @transform_0(%arg0: i32) -> (i32, i32) {
    %c0_i32 = arith.constant 0 : i32
    %c0_i32_0 = arith.constant 0 : i32
    %c0_i32_1 = arith.constant 0 : i32
    return %c0_i32, %c0_i32_0 : i32, i32
  }
  func.func @transform_1(%arg0: i32) -> (i32, i32, i32) {
    %c0_i32 = arith.constant 0 : i32
    %c0_i32_0 = arith.constant 0 : i32
    %c0_i32_1 = arith.constant 0 : i32
    return %c0_i32, %c0_i32_0, %arg0 : i32, i32, i32
  }
  func.func @transform_2(%arg0: i32) -> (i32, i32) {
    %c0_i32 = arith.constant 0 : i32
    %c0_i32_0 = arith.constant 0 : i32
    return %c0_i32, %arg0 : i32, i32
  }
}

module attributes {stable_mosaic.version = 11 : i64} {
  func.func @_conv_pool_act_kernel(%arg0: i32, %arg1: memref<16x80xbf16, #tpu.memory_space<vmem>>, %arg2: memref<1x80x128xbf16, #tpu.memory_space<vmem>>, %arg3: memref<16x128xbf16, #tpu.memory_space<vmem>>) attributes {dimension_semantics = [#tpu.dimension_semantics<parallel>], iteration_bounds = array<i64: 1>, scalar_prefetch = 0 : i64, scratch_operands = 0 : i64, tpu.core_type = #tpu.core_type<tc>, window_params = [{pipeline_mode = #tpu.pipeline_mode<synchronous>, transform_indices = @transform_0, window_bounds = array<i64: 16, 80>}, {transform_indices = @transform_1, window_bounds = array<i64: 1, 80, 128>}, {transform_indices = @transform_2, window_bounds = array<i64: 16, 128>}]} {
    %c0 = arith.constant 0 : index
    %c0_0 = arith.constant 0 : index
    %0 = vector.load %arg1[%c0, %c0_0] : memref<16x80xbf16, #tpu.memory_space<vmem>>, vector<16x80xbf16>
    %c0_1 = arith.constant 0 : index
    %c0_2 = arith.constant 0 : index
    %c0_3 = arith.constant 0 : index
    %1 = vector.load %arg2[%c0_1, %c0_2, %c0_3] : memref<1x80x128xbf16, #tpu.memory_space<vmem>>, vector<1x80x128xbf16>
    %2 = vector.shape_cast %1 : vector<1x80x128xbf16> to vector<80x128xbf16>
    %cst = arith.constant dense<0.000000e+00> : vector<16x128xf32>
    %3 = tpu.matmul %0, %2, %cst {dimension_numbers = #tpu.dot_dimension_numbers<[1], [0], [0], [1], [0, 0, 1, 1], [], []>} : vector<16x80xbf16>, vector<80x128xbf16>, vector<16x128xf32> -> vector<16x128xf32>
    %cst_4 = arith.constant 0.000000e+00 : f32
    %4 = vector.broadcast %cst_4 : f32 to vector<16x128xf32>
    %5 = arith.maximumf %3, %4 : vector<16x128xf32>
    %6 = arith.truncf %5 : vector<16x128xf32> to vector<16x128xbf16>
    %c0_5 = arith.constant 0 : index
    %c0_6 = arith.constant 0 : index
    %7 = vector.load %arg3[%c0_5, %c0_6] : memref<16x128xbf16, #tpu.memory_space<vmem>>, vector<16x128xbf16>
    tpu.vector_store %arg3[%c0_5, %c0_6], %6 {strides = array<i32>} : memref<16x128xbf16, #tpu.memory_space<vmem>>, vector<16x128xbf16>,
    return
  }
  func.func @transform_0(%arg0: i32) -> (i32, i32) {
    %c0_i32 = arith.constant 0 : i32
    %c0_i32_0 = arith.constant 0 : i32
    %c0_i32_1 = arith.constant 0 : i32
    return %c0_i32, %c0_i32_0 : i32, i32
  }
  func.func @transform_1(%arg0: i32) -> (i32, i32, i32) {
    %c0_i32 = arith.constant 0 : i32
    %c0_i32_0 = arith.constant 0 : i32
    %c0_i32_1 = arith.constant 0 : i32
    return %c0_i32, %c0_i32_0, %arg0 : i32, i32, i32
  }
  func.func @transform_2(%arg0: i32) -> (i32, i32) {
    %c0_i32 = arith.constant 0 : i32
    %c0_i32_0 = arith.constant 0 : i32
    return %c0_i32, %arg0 : i32, i32
  }
}

module attributes {stable_mosaic.version = 11 : i64} {
  func.func @_conv_pool_act_kernel(%arg0: i32, %arg1: memref<16x240xbf16, #tpu.memory_space<vmem>>, %arg2: memref<1x240x128xbf16, #tpu.memory_space<vmem>>, %arg3: memref<16x128xf32, #tpu.memory_space<vmem>>) attributes {dimension_semantics = [#tpu.dimension_semantics<parallel>], iteration_bounds = array<i64: 1>, scalar_prefetch = 0 : i64, scratch_operands = 0 : i64, tpu.core_type = #tpu.core_type<tc>, window_params = [{pipeline_mode = #tpu.pipeline_mode<synchronous>, transform_indices = @transform_0, window_bounds = array<i64: 16, 240>}, {transform_indices = @transform_1, window_bounds = array<i64: 1, 240, 128>}, {transform_indices = @transform_2, window_bounds = array<i64: 16, 128>}]} {
    %c0 = arith.constant 0 : index
    %c0_0 = arith.constant 0 : index
    %0 = vector.load %arg1[%c0, %c0_0] : memref<16x240xbf16, #tpu.memory_space<vmem>>, vector<16x240xbf16>
    %c0_1 = arith.constant 0 : index
    %c0_2 = arith.constant 0 : index
    %c0_3 = arith.constant 0 : index
    %1 = vector.load %arg2[%c0_1, %c0_2, %c0_3] : memref<1x240x128xbf16, #tpu.memory_space<vmem>>, vector<1x240x128xbf16>
    %2 = vector.shape_cast %1 : vector<1x240x128xbf16> to vector<240x128xbf16>
    %cst = arith.constant dense<0.000000e+00> : vector<16x128xf32>
    %3 = tpu.matmul %0, %2, %cst {dimension_numbers = #tpu.dot_dimension_numbers<[1], [0], [0], [1], [0, 0, 1, 1], [], []>} : vector<16x240xbf16>, vector<240x128xbf16>, vector<16x128xf32> -> vector<16x128xf32>
    %cst_4 = arith.constant 5.000000e-01 : f32
    %4 = vector.broadcast %cst_4 : f32 to vector<16x128xf32>
    %5 = arith.mulf %4, %3 : vector<16x128xf32>
    %6 = math.tanh %5 : vector<16x128xf32>
    %cst_5 = arith.constant 1.000000e+00 : f32
    %7 = vector.broadcast %cst_5 : f32 to vector<16x128xf32>
    %8 = arith.addf %6, %7 : vector<16x128xf32>
    %cst_6 = arith.constant 5.000000e-01 : f32
    %9 = vector.broadcast %cst_6 : f32 to vector<16x128xf32>
    %10 = arith.mulf %9, %8 : vector<16x128xf32>
    %c0_7 = arith.constant 0 : index
    %c0_8 = arith.constant 0 : index
    %11 = vector.load %arg3[%c0_7, %c0_8] : memref<16x128xf32, #tpu.memory_space<vmem>>, vector<16x128xf32>
    tpu.vector_store %arg3[%c0_7, %c0_8], %10 {strides = array<i32>} : memref<16x128xf32, #tpu.memory_space<vmem>>, vector<16x128xf32>,
    return
  }
  func.func @transform_0(%arg0: i32) -> (i32, i32) {
    %c0_i32 = arith.constant 0 : i32
    %c0_i32_0 = arith.constant 0 : i32
    %c0_i32_1 = arith.constant 0 : i32
    return %c0_i32, %c0_i32_0 : i32, i32
  }
  func.func @transform_1(%arg0: i32) -> (i32, i32, i32) {
    %c0_i32 = arith.constant 0 : i32
    %c0_i32_0 = arith.constant 0 : i32
    %c0_i32_1 = arith.constant 0 : i32
    return %c0_i32, %c0_i32_0, %arg0 : i32, i32, i32
  }
  func.func @transform_2(%arg0: i32) -> (i32, i32) {
    %c0_i32 = arith.constant 0 : i32
    %c0_i32_0 = arith.constant 0 : i32
    return %c0_i32, %arg0 : i32, i32
  }
}

</mosaic_0001>

<bundles_post_ra>
// kernel: wikiart_part2_forward.4
= control target key start
LH: loop header
LB: loop body
LE: loop exit
PB: predicated region body
PF: predicated region fallthrough
CT: control target
= control target key end

     0   :  { %v539_v0 = vmov 0.0   ;;  %vm540_vm0 = vmmov 0   ;;  %vm59_vm1 = vcmask 654336   ;;  %s654_s1 = inlined_call_operand.vmem [shape: bf16[4,80,128], index: 1, kind: input, shape index: {}]   ;;  %s655_s0 = inlined_call_operand.vmem [shape: bf16[16,80], index: 0, kind: input, shape index: {}]   ;;  %s656_s2 = inlined_call_operand.vmem [shape: bf16[16,128], index: 2, kind: output, shape index: {}]  }
   0x1   :  { %460 = vmatprep.subr.bf16.mxu0 %v539_v0  ;;  %474 = vmatprep.subr.bf16.mxu1 %v539_v0  ;;  %v518_v1 = vld [vmem:[%s654_s1] sm:$0xff]   ;;  %v519_v2 = vld [vmem:[%s654_s1 + $0x28] sm:$0xff]   ;;  %v521_v4 = vld [vmem:[%s654_s1 + $0x30] sm:$0xff]  }
   0x2   :  { %470 = vmatprep.mubr.msk.bf16.mxu0 %vm540_vm0, %v539_v0  ;;  %484 = vmatprep.mubr.msk.bf16.mxu1 %vm540_vm0, %v539_v0  ;;  %v520_v3 = vld [vmem:[%s654_s1 + $0x8] sm:$0xff]   ;;  %v522_v5 = vld [vmem:[%s654_s1 + $0x10] sm:$0xff]   ;;  %v523_v6 = vld [vmem:[%s654_s1 + $0x38] sm:$0xff]  }
   0x3   :  { %461 = vmatpush3.bf16.msra.mxu0 %v518_v1  ;;  %475 = vmatpush3.bf16.msra.mxu1 %v519_v2  ;;  %v524_v7 = vld [vmem:[%s654_s1 + $0x18] sm:$0xff]   ;;  %v525_v8 = vld [vmem:[%s654_s1 + $0x40] sm:$0xff]   ;;  %v527_v10 = vld [vmem:[%s654_s1 + $0x48] sm:$0xff]  }
   0x4   :  { %462 = vmatprep.subr.bf16.mxu0 %v539_v0  ;;  %476 = vmatprep.subr.bf16.mxu1 %v539_v0  ;;  %v526_v9 = vld [vmem:[%s654_s1 + $0x20] sm:$0xff]   ;;  %v529_v12 = vld [vmem:[%s654_s1 + $0x50] sm:$0xff]   ;;  %v530_v13 = vld [vmem:[%s654_s1 + $0x78] sm:$0xff]  }
   0x5   :  { %v528_v11 = vld [vmem:[%s655_s0] sm:$0xff]   ;;  %v531_v14 = vld [vmem:[%s654_s1 + $0x58] sm:$0xff]   ;;  %v534_v17 = vld [vmem:[%s654_s1 + $0x88] sm:$0xff]  }
   0x6   :  { %v532_v15 = vld [vmem:[%s654_s1 + $0x80] sm:$0xff]   ;;  %v535_v18 = vld [vmem:[%s654_s1 + $0x68] sm:$0xff]   ;;  %v536_v19 = vld [vmem:[%s654_s1 + $0x90] sm:$0xff]  }
   0x7   :  { %463 = vmatpush3.bf16.msra.mxu0 %v520_v3  ;;  %477 = vmatpush3.bf16.msra.mxu1 %v521_v4  ;;  %v533_v16 = vld [vmem:[%s654_s1 + $0x60] sm:$0xff]   ;;  %v537_v20 = vld [vmem:[%s654_s1 + $0x70] sm:$0xff]   ;;  %v538_v21 = vld [vmem:[%s654_s1 + $0x98] sm:$0xff]  }
   0x8   :  { %464 = vmatprep.subr.bf16.mxu0 %v539_v0  ;;  %478 = vmatprep.subr.bf16.mxu1 %v539_v0 }
   0xb   :  { %465 = vmatpush3.bf16.msra.mxu0 %v522_v5  ;;  %479 = vmatpush3.bf16.msra.mxu1 %v523_v6 }
   0xc   :  { %466 = vmatprep.subr.bf16.mxu0 %v539_v0  ;;  %480 = vmatprep.subr.bf16.mxu1 %v539_v0 }
   0xf   :  { %467 = vmatpush3.bf16.msra.mxu0 %v524_v7  ;;  %481 = vmatpush3.bf16.msra.mxu1 %v525_v8 }
  0x10   :  { %468 = vmatprep.subr.bf16.mxu0 %v539_v0  ;;  %482 = vmatprep.subr.bf16.mxu1 %v539_v0 }
  0x13   :  { %469 = vmatpush3.bf16.msra.mxu0 %v526_v9  ;;  %483 = vmatpush3.bf16.msra.mxu1 %v527_v10 }
  0x14   :  { %488 = vmatprep.subr.bf16.mxu0 %v539_v0  ;;  %502 = vmatprep.subr.bf16.mxu1 %v539_v0 }
  0x16   :  { %471 = vmatmul.mubr.msk.bf16.vlgmr.msra.gmra.mrb[0].mxu0 %vm59_vm1, %v528_v11  ;;  %485 = vmatmul.mubr.msk.bf16.vlgmr.msra.gmra.mrb[0].mxu1 %vm59_vm1, %v528_v11 }
  0x17   :  { %489 = vmatpush3.bf16.msra.mxu0 %v529_v12  ;;  %503 = vmatpush3.bf16.msra.mxu1 %v530_v13 }
  0x18   :  { %490 = vmatprep.subr.bf16.mxu0 %v539_v0  ;;  %504 = vmatprep.subr.bf16.mxu1 %v539_v0 }
  0x19   :  { %498 = vmatprep.mubr.msk.bf16.mxu0 %vm540_vm0, %v539_v0  ;;  %512 = vmatprep.mubr.msk.bf16.mxu1 %vm540_vm0, %v539_v0 }
  0x1b   :  { %491 = vmatpush3.bf16.msra.mxu0 %v531_v14  ;;  %505 = vmatpush3.bf16.msra.mxu1 %v532_v15 }
  0x1c   :  { %492 = vmatprep.subr.bf16.mxu0 %v539_v0  ;;  %506 = vmatprep.subr.bf16.mxu1 %v539_v0 }
  0x1f   :  { %493 = vmatpush3.bf16.msra.mxu0 %v533_v16  ;;  %507 = vmatpush3.bf16.msra.mxu1 %v534_v17 }
  0x20   :  { %494 = vmatprep.subr.bf16.mxu0 %v539_v0  ;;  %508 = vmatprep.subr.bf16.mxu1 %v539_v0 }
  0x23   :  { %495 = vmatpush3.bf16.msra.mxu0 %v535_v18  ;;  %509 = vmatpush3.bf16.msra.mxu1 %v536_v19 }
  0x24   :  { %496 = vmatprep.subr.bf16.mxu0 %v539_v0  ;;  %510 = vmatprep.subr.bf16.mxu1 %v539_v0 }
  0x27   :  { %497 = vmatpush3.bf16.msra.mxu0 %v537_v20  ;;  %511 = vmatpush3.bf16.msra.mxu1 %v538_v21 }
  0x2a   :  { %499 = vmatmul.mubr.msk.bf16.vlgmr.msra.gmra.mrb[4].mxu0 %vm59_vm1, %v528_v11  ;;  %513 = vmatmul.mubr.msk.bf16.vlgmr.msra.gmra.mrb[4].mxu1 %vm59_vm1, %v528_v11 }
  0xe9   :  { %v97_v22 = vpop.f32.mrb[0].mxu0  ;;  %v179_v23 = vpop.f32.mrb[0].mxu1 }
  0xea   :  { %v472_v24 = vpop.f32.mrb[1].mxu0  ;;  %v186_v25 = vmax.f32 %v97_v22, %v179_v23  ;;  %v486_v26 = vpop.f32.mrb[1].mxu1 }
  0xeb   :  { %v100_v27 = vpop.f32.mrb[2].mxu0  ;;  %v182_v28 = vpop.f32.mrb[2].mxu1 }
  0xec   :  { %v473_v29 = vpop.f32.mrb[3].mxu0  ;;  %v187_v30 = vmax.f32 %v100_v27, %v182_v28  ;;  %v487_v31 = vpop.f32.mrb[3].mxu1 }
  0xfd   :  { %v263_v32 = vpop.f32.mrb[4].mxu0  ;;  %v347_v34 = vpop.f32.mrb[4].mxu1 }
  0xfe   :  { %v270_v33 = vmax.f32 %v186_v25, %v263_v32  ;;  %v500_v35 = vpop.f32.mrb[5].mxu0  ;;  %v514_v36 = vpop.f32.mrb[5].mxu1 }
  0xff   :  { %v266_v37 = vpop.f32.mrb[6].mxu0  ;;  %v350_v40 = vpop.f32.mrb[6].mxu1 }
 0x100   :  { %v354_v38 = vmax.f32 %v270_v33, %v347_v34  ;;  %v271_v39 = vmax.f32 %v187_v30, %v266_v37  ;;  %v501_v41 = vpop.f32.mrb[7].mxu0  ;;  %v515_v42 = vpop.f32.mrb[7].mxu1 }
 0x102   :  { %v355_v43 = vmax.f32 %v271_v39, %v350_v40  ;;  %v356_v44 = vmax.f32 %v354_v38, 0.0 }
 0x104   :  { %v357_v45 = vmax.f32 %v355_v43, 0.0 }
 0x106   :  { %v434_v46 = vpack.c.bf16 %v357_v45, %v356_v44 }
 0x108   :  { %435 = vst [vmem:[%s656_s2] sm:$0xff] %v434_v46  }

// kernel: wikiart_part2_forward.5
= control target key start
LH: loop header
LB: loop body
LE: loop exit
PB: predicated region body
PF: predicated region fallthrough
CT: control target
= control target key end

     0   :  { %v906_v0 = vmov 0   ;;  %vm143_vm0 = vcmask 916480   ;;  %s1184_s1 = inlined_call_operand.vmem [shape: bf16[4,240,128], index: 1, kind: input, shape index: {}]   ;;  %s1185_s0 = inlined_call_operand.vmem [shape: bf16[16,240], index: 0, kind: input, shape index: {}]   ;;  %s1186_s2 = inlined_call_operand.vmem [shape: f32[16,128], index: 2, kind: output, shape index: {}]  }
   0x1   :  { %147 = vmatprep.subr.bf16.mxu0 %v906_v0  ;;  %309 = vmatprep.subr.bf16.mxu1 %v906_v0  ;;  %v843_v1 = vld [vmem:[%s1184_s1] sm:$0xff]   ;;  %v844_v2 = vld [vmem:[%s1184_s1 + $0x78] sm:$0xff]   ;;  %v845_v3 = vld [vmem:[%s1184_s1 + $0x8] sm:$0xff]  }
   0x2   :  { %148 = vmatpush1.bf16.msra.mxu0 %v843_v1  ;;  %310 = vmatpush1.bf16.msra.mxu1 %v844_v2  ;;  %v846_v4 = vld [vmem:[%s1184_s1 + $0x80] sm:$0xff]   ;;  %v847_v5 = vld [vmem:[%s1184_s1 + $0x10] sm:$0xff]   ;;  %v848_v6 = vld [vmem:[%s1184_s1 + $0x88] sm:$0xff]  }
   0x3   :  { %149 = vmatprep.subr.bf16.mxu0 %v906_v0  ;;  %311 = vmatprep.subr.bf16.mxu1 %v906_v0  ;;  %v849_v7 = vld [vmem:[%s1184_s1 + $0x18] sm:$0xff]   ;;  %v850_v8 = vld [vmem:[%s1184_s1 + $0x90] sm:$0xff]   ;;  %v851_v9 = vld [vmem:[%s1184_s1 + $0x20] sm:$0xff]  }
   0x4   :  { %v852_v10 = vld [vmem:[%s1184_s1 + $0x98] sm:$0xff]   ;;  %v853_v11 = vld [vmem:[%s1184_s1 + $0x28] sm:$0xff]   ;;  %v854_v12 = vld [vmem:[%s1184_s1 + $0xa0] sm:$0xff]  }
   0x5   :  { %v855_v13 = vld [vmem:[%s1184_s1 + $0x30] sm:$0xff]   ;;  %v856_v14 = vld [vmem:[%s1184_s1 + $0xa8] sm:$0xff]   ;;  %v857_v15 = vld [vmem:[%s1184_s1 + $0x38] sm:$0xff]  }
   0x6   :  { %150 = vmatpush1.bf16.msra.mxu0 %v845_v3  ;;  %312 = vmatpush1.bf16.msra.mxu1 %v846_v4  ;;  %v858_v16 = vld [vmem:[%s1184_s1 + $0xb0] sm:$0xff]   ;;  %v859_v17 = vld [vmem:[%s1184_s1 + $0x40] sm:$0xff]   ;;  %v860_v19 = vld [vmem:[%s1184_s1 + $0xb8] sm:$0xff]  }
   0x7   :  { %151 = vmatprep.subr.bf16.mxu0 %v906_v0  ;;  %313 = vmatprep.subr.bf16.mxu1 %v906_v0  ;;  %v873_v18 = vld [vmem:[%s1185_s0 + $0x4] ss:$8 sps:$4 sm:$0xff]   ;;  %v863_v22 = vld [vmem:[%s1184_s1 + $0x50] sm:$0xff]   ;;  %v865_v24 = vld [vmem:[%s1184_s1 + $0x58] sm:$0xff]  }
   0x8   :  { %703 = vmatprep.mubr.msk.bf16.mxu0 %vm143_vm0, %v873_v18  ;;  %749 = vmatprep.mubr.msk.bf16.mxu1 %vm143_vm0, %v873_v18  ;;  %v861_v20 = vld [vmem:[%s1184_s1 + $0x48] sm:$0xff]   ;;  %v862_v21 = vld [vmem:[%s1184_s1 + $0xc0] sm:$0xff]   ;;  %v866_v25 = vld [vmem:[%s1184_s1 + $0xd0] sm:$0xff]  }
   0x9   :  { %v864_v23 = vld [vmem:[%s1184_s1 + $0xc8] sm:$0xff]   ;;  %v867_v26 = vld [vmem:[%s1184_s1 + $0x60] sm:$0xff]   ;;  %v868_v27 = vld [vmem:[%s1184_s1 + $0xd8] sm:$0xff]  }
   0xa   :  { %152 = vmatpush1.bf16.msra.mxu0 %v847_v5  ;;  %314 = vmatpush1.bf16.msra.mxu1 %v848_v6  ;;  %v869_v28 = vld [vmem:[%s1184_s1 + $0x68] sm:$0xff]   ;;  %v870_v29 = vld [vmem:[%s1184_s1 + $0xe0] sm:$0xff]   ;;  %v871_v30 = vld [vmem:[%s1184_s1 + $0x70] sm:$0xff]  }
   0xb   :  { %153 = vmatprep.subr.bf16.mxu0 %v906_v0  ;;  %315 = vmatprep.subr.bf16.mxu1 %v906_v0  ;;  %v872_v31 = vld [vmem:[%s1184_s1 + $0xe8] sm:$0xff]   ;;  %v876_v33 = vld [vmem:[%s1184_s1 + $0xf0] sm:$0xff]   ;;  %v878_v35 = vld [vmem:[%s1184_s1 + $0xf8] sm:$0xff]  }
   0xc   :  { %v1050_v32 = vld [vmem:[%s1185_s0] ss:$8 sps:$4 sm:$0xff]   ;;  %v879_v36 = vld [vmem:[%s1184_s1 + $0x170] sm:$0xff]   ;;  %v881_v38 = vld [vmem:[%s1184_s1 + $0x178] sm:$0xff]  }
   0xd   :  { %v877_v34 = vld [vmem:[%s1184_s1 + $0x168] sm:$0xff]   ;;  %v880_v37 = vld [vmem:[%s1184_s1 + $0x100] sm:$0xff]   ;;  %v884_v41 = vld [vmem:[%s1184_s1 + $0x110] sm:$0xff]  }
   0xe   :  { %154 = vmatpush1.bf16.msra.mxu0 %v849_v7  ;;  %316 = vmatpush1.bf16.msra.mxu1 %v850_v8  ;;  %v882_v39 = vld [vmem:[%s1184_s1 + $0x108] sm:$0xff]   ;;  %v883_v40 = vld [vmem:[%s1184_s1 + $0x180] sm:$0xff]   ;;  %v886_v43 = vld [vmem:[%s1184_s1 + $0x118] sm:$0xff]  }
   0xf   :  { %155 = vmatprep.subr.bf16.mxu0 %v906_v0  ;;  %317 = vmatprep.subr.bf16.mxu1 %v906_v0  ;;  %v885_v42 = vld [vmem:[%s1184_s1 + $0x188] sm:$0xff]   ;;  %v887_v44 = vld [vmem:[%s1184_s1 + $0x190] sm:$0xff]   ;;  %v888_v45 = vld [vmem:[%s1184_s1 + $0x120] sm:$0xff]  }
  0x10   :  { %v889_v46 = vld [vmem:[%s1184_s1 + $0x198] sm:$0xff]   ;;  %v890_v47 = vld [vmem:[%s1184_s1 + $0x128] sm:$0xff]   ;;  %v891_v48 = vld [vmem:[%s1184_s1 + $0x1a0] sm:$0xff]  }
  0x11   :  { %v892_v49 = vld [vmem:[%s1184_s1 + $0x130] sm:$0xff]   ;;  %v893_v50 = vld [vmem:[%s1184_s1 + $0x1a8] sm:$0xff]   ;;  %v894_v51 = vld [vmem:[%s1184_s1 + $0x138] sm:$0xff]  }
  0x12   :  { %156 = vmatpush1.bf16.msra.mxu0 %v851_v9  ;;  %318 = vmatpush1.bf16.msra.mxu1 %v852_v10  ;;  %v895_v52 = vld [vmem:[%s1184_s1 + $0x1b0] sm:$0xff]   ;;  %v896_v53 = vld [vmem:[%s1184_s1 + $0x140] sm:$0xff]   ;;  %v897_v54 = vld [vmem:[%s1184_s1 + $0x1b8] sm:$0xff]  }
  0x13   :  { %157 = vmatprep.subr.bf16.mxu0 %v906_v0  ;;  %319 = vmatprep.subr.bf16.mxu1 %v906_v0  ;;  %v898_v55 = vld [vmem:[%s1184_s1 + $0x148] sm:$0xff]   ;;  %v899_v56 = vld [vmem:[%s1184_s1 + $0x1c0] sm:$0xff]   ;;  %v900_v57 = vld [vmem:[%s1184_s1 + $0x150] sm:$0xff]  }
  0x14   :  { %v901_v58 = vld [vmem:[%s1184_s1 + $0x1c8] sm:$0xff]   ;;  %v902_v59 = vld [vmem:[%s1184_s1 + $0x158] sm:$0xff]   ;;  %v903_v60 = vld [vmem:[%s1184_s1 + $0x1d0] sm:$0xff]  }
  0x15   :  { %v904_v61 = vld [vmem:[%s1184_s1 + $0x160] sm:$0xff]   ;;  %v905_v62 = vld [vmem:[%s1184_s1 + $0x1d8] sm:$0xff]  }
  0x16   :  { %158 = vmatpush1.bf16.msra.mxu0 %v853_v11  ;;  %320 = vmatpush1.bf16.msra.mxu1 %v854_v12 }
  0x17   :  { %159 = vmatprep.subr.bf16.mxu0 %v906_v0  ;;  %321 = vmatprep.subr.bf16.mxu1 %v906_v0 }
  0x1a   :  { %160 = vmatpush1.bf16.msra.mxu0 %v855_v13  ;;  %322 = vmatpush1.bf16.msra.mxu1 %v856_v14 }
  0x1b   :  { %161 = vmatprep.subr.bf16.mxu0 %v906_v0  ;;  %323 = vmatprep.subr.bf16.mxu1 %v906_v0 }
  0x1e   :  { %162 = vmatpush1.bf16.msra.mxu0 %v857_v15  ;;  %324 = vmatpush1.bf16.msra.mxu1 %v858_v16 }
  0x1f   :  { %163 = vmatprep.subr.bf16.mxu0 %v906_v0  ;;  %325 = vmatprep.subr.bf16.mxu1 %v906_v0 }
  0x22   :  { %164 = vmatpush1.bf16.msra.mxu0 %v859_v17  ;;  %326 = vmatpush1.bf16.msra.mxu1 %v860_v19 }
  0x23   :  { %165 = vmatprep.subr.bf16.mxu0 %v906_v0  ;;  %327 = vmatprep.subr.bf16.mxu1 %v906_v0 }
  0x26   :  { %166 = vmatpush1.bf16.msra.mxu0 %v861_v20  ;;  %328 = vmatpush1.bf16.msra.mxu1 %v862_v21 }
  0x27   :  { %167 = vmatprep.subr.bf16.mxu0 %v906_v0  ;;  %329 = vmatprep.subr.bf16.mxu1 %v906_v0 }
  0x2a   :  { %168 = vmatpush1.bf16.msra.mxu0 %v863_v22  ;;  %330 = vmatpush1.bf16.msra.mxu1 %v864_v23 }
  0x2b   :  { %169 = vmatprep.subr.bf16.mxu0 %v906_v0  ;;  %331 = vmatprep.subr.bf16.mxu1 %v906_v0 }
  0x2e   :  { %170 = vmatpush1.bf16.msra.mxu0 %v865_v24  ;;  %332 = vmatpush1.bf16.msra.mxu1 %v866_v25 }
  0x2f   :  { %171 = vmatprep.subr.bf16.mxu0 %v906_v0  ;;  %333 = vmatprep.subr.bf16.mxu1 %v906_v0 }
  0x32   :  { %172 = vmatpush1.bf16.msra.mxu0 %v867_v26  ;;  %334 = vmatpush1.bf16.msra.mxu1 %v868_v27 }
  0x33   :  { %173 = vmatprep.subr.bf16.mxu0 %v906_v0  ;;  %335 = vmatprep.subr.bf16.mxu1 %v906_v0 }
  0x36   :  { %174 = vmatpush1.bf16.msra.mxu0 %v869_v28  ;;  %336 = vmatpush1.bf16.msra.mxu1 %v870_v29 }
  0x37   :  { %175 = vmatprep.subr.bf16.mxu0 %v906_v0  ;;  %337 = vmatprep.subr.bf16.mxu1 %v906_v0 }
  0x3a   :  { %176 = vmatpush1.bf16.msra.mxu0 %v871_v30  ;;  %338 = vmatpush1.bf16.msra.mxu1 %v872_v31 }
  0x3b   :  { %473 = vmatprep.subr.bf16.mxu0 %v906_v0  ;;  %637 = vmatprep.subr.bf16.mxu1 %v906_v0 }
  0x3d   :  { %180 = vmatmul.mubr.bf16.vlgmr.msra.gmra.mrb[0].mxu0 %v1050_v32  ;;  %342 = vmatmul.mubr.bf16.vlgmr.msra.gmra.mrb[0].mxu1 %v1050_v32 }
  0x3e   :  { %474 = vmatpush1.bf16.msra.mxu0 %v876_v33  ;;  %638 = vmatpush1.bf16.msra.mxu1 %v877_v34 }
  0x3f   :  { %475 = vmatprep.subr.bf16.mxu0 %v906_v0  ;;  %639 = vmatprep.subr.bf16.mxu1 %v906_v0 }
  0x40   :  { %795 = vmatprep.mubr.msk.bf16.mxu0 %vm143_vm0, %v873_v18  ;;  %841 = vmatprep.mubr.msk.bf16.mxu1 %vm143_vm0, %v873_v18 }
  0x42   :  { %476 = vmatpush1.bf16.msra.mxu0 %v878_v35  ;;  %640 = vmatpush1.bf16.msra.mxu1 %v879_v36 }
  0x43   :  { %477 = vmatprep.subr.bf16.mxu0 %v906_v0  ;;  %641 = vmatprep.subr.bf16.mxu1 %v906_v0 }
  0x46   :  { %478 = vmatpush1.bf16.msra.mxu0 %v880_v37  ;;  %642 = vmatpush1.bf16.msra.mxu1 %v881_v38 }
  0x47   :  { %479 = vmatprep.subr.bf16.mxu0 %v906_v0  ;;  %643 = vmatprep.subr.bf16.mxu1 %v906_v0 }
  0x4a   :  { %480 = vmatpush1.bf16.msra.mxu0 %v882_v39  ;;  %644 = vmatpush1.bf16.msra.mxu1 %v883_v40 }
  0x4b   :  { %481 = vmatprep.subr.bf16.mxu0 %v906_v0  ;;  %645 = vmatprep.subr.bf16.mxu1 %v906_v0 }
  0x4e   :  { %482 = vmatpush1.bf16.msra.mxu0 %v884_v41  ;;  %646 = vmatpush1.bf16.msra.mxu1 %v885_v42 }
  0x4f   :  { %483 = vmatprep.subr.bf16.mxu0 %v906_v0  ;;  %647 = vmatprep.subr.bf16.mxu1 %v906_v0 }
  0x52   :  { %484 = vmatpush1.bf16.msra.mxu0 %v886_v43  ;;  %648 = vmatpush1.bf16.msra.mxu1 %v887_v44 }
  0x53   :  { %485 = vmatprep.subr.bf16.mxu0 %v906_v0  ;;  %649 = vmatprep.subr.bf16.mxu1 %v906_v0 }
  0x56   :  { %486 = vmatpush1.bf16.msra.mxu0 %v888_v45  ;;  %650 = vmatpush1.bf16.msra.mxu1 %v889_v46 }
  0x57   :  { %487 = vmatprep.subr.bf16.mxu0 %v906_v0  ;;  %651 = vmatprep.subr.bf16.mxu1 %v906_v0 }
  0x5a   :  { %488 = vmatpush1.bf16.msra.mxu0 %v890_v47  ;;  %652 = vmatpush1.bf16.msra.mxu1 %v891_v48 }
  0x5b   :  { %489 = vmatprep.subr.bf16.mxu0 %v906_v0  ;;  %653 = vmatprep.subr.bf16.mxu1 %v906_v0 }
  0x5e   :  { %490 = vmatpush1.bf16.msra.mxu0 %v892_v49  ;;  %654 = vmatpush1.bf16.msra.mxu1 %v893_v50 }
  0x5f   :  { %491 = vmatprep.subr.bf16.mxu0 %v906_v0  ;;  %655 = vmatprep.subr.bf16.mxu1 %v906_v0 }
  0x62   :  { %492 = vmatpush1.bf16.msra.mxu0 %v894_v51  ;;  %656 = vmatpush1.bf16.msra.mxu1 %v895_v52 }
  0x63   :  { %493 = vmatprep.subr.bf16.mxu0 %v906_v0  ;;  %657 = vmatprep.subr.bf16.mxu1 %v906_v0 }
  0x66   :  { %494 = vmatpush1.bf16.msra.mxu0 %v896_v53  ;;  %658 = vmatpush1.bf16.msra.mxu1 %v897_v54 }
  0x67   :  { %495 = vmatprep.subr.bf16.mxu0 %v906_v0  ;;  %659 = vmatprep.subr.bf16.mxu1 %v906_v0 }
  0x6a   :  { %496 = vmatpush1.bf16.msra.mxu0 %v898_v55  ;;  %660 = vmatpush1.bf16.msra.mxu1 %v899_v56 }
  0x6b   :  { %497 = vmatprep.subr.bf16.mxu0 %v906_v0  ;;  %661 = vmatprep.subr.bf16.mxu1 %v906_v0 }
  0x6e   :  { %498 = vmatpush1.bf16.msra.mxu0 %v900_v57  ;;  %662 = vmatpush1.bf16.msra.mxu1 %v901_v58 }
  0x6f   :  { %499 = vmatprep.subr.bf16.mxu0 %v906_v0  ;;  %663 = vmatprep.subr.bf16.mxu1 %v906_v0 }
  0x72   :  { %500 = vmatpush1.bf16.msra.mxu0 %v902_v59  ;;  %664 = vmatpush1.bf16.msra.mxu1 %v903_v60 }
  0x73   :  { %501 = vmatprep.subr.bf16.mxu0 %v906_v0  ;;  %665 = vmatprep.subr.bf16.mxu1 %v906_v0 }
  0x76   :  { %502 = vmatpush1.bf16.msra.mxu0 %v904_v61  ;;  %666 = vmatpush1.bf16.msra.mxu1 %v905_v62 }
  0x79   :  { %506 = vmatmul.mubr.bf16.vlgmr.msra.gmra.mrb[4].mxu0 %v1050_v32  ;;  %670 = vmatmul.mubr.bf16.vlgmr.msra.gmra.mrb[4].mxu1 %v1050_v32 }
 0x110   :  { %v181_v63 = vpop.f32.mrb[0].mxu0  ;;  %v343_v1 = vpop.f32.mrb[0].mxu1 }
 0x111   :  { %v183_v2 = vpop.f32.mrb[1].mxu0  ;;  %v350_v3 = vmax.f32 %v181_v63, %v343_v1  ;;  %v345_v4 = vpop.f32.mrb[1].mxu1 }
 0x112   :  { %v184_v5 = vpop.f32.mrb[2].mxu0  ;;  %v346_v6 = vpop.f32.mrb[2].mxu1 }
 0x113   :  { %v186_v7 = vpop.f32.mrb[3].mxu0  ;;  %v351_v8 = vmax.f32 %v184_v5, %v346_v6  ;;  %v348_v9 = vpop.f32.mrb[3].mxu1 }
 0x14c   :  { %v507_v10 = vpop.f32.mrb[4].mxu0  ;;  %v671_v12 = vpop.f32.mrb[4].mxu1 }
 0x14d   :  { %v514_v11 = vmax.f32 %v350_v3, %v507_v10  ;;  %v509_v0 = vpop.f32.mrb[5].mxu0  ;;  %v673_v13 = vpop.f32.mrb[5].mxu1 }
 0x14e   :  { %v510_v14 = vpop.f32.mrb[6].mxu0  ;;  %v674_v17 = vpop.f32.mrb[6].mxu1 }
 0x14f   :  { %v678_v15 = vmax.f32 %v514_v11, %v671_v12  ;;  %v515_v16 = vmax.f32 %v351_v8, %v510_v14  ;;  %v512_v18 = vpop.f32.mrb[7].mxu0  ;;  %v676_v19 = vpop.f32.mrb[7].mxu1 }
 0x151   :  { %680 = vst [vmem:[%s1186_s2] sm:$0xff] %v678_v15  ;;  %v679_v20 = vmax.f32 %v515_v16, %v674_v17 }
 0x153   :  { %681 = vst [vmem:[%s1186_s2 + $0x8] sm:$0xff] %v679_v20 }

// kernel: wikiart_part2_forward.6
= control target key start
LH: loop header
LB: loop body
LE: loop exit
PB: predicated region body
PF: predicated region fallthrough
CT: control target
= control target key end

     0   :  { %v164_v0 = vmov 0.0   ;;  %vm165_vm0 = vmmov 0   ;;  %vm59_vm1 = vcmask 654336   ;;  %s202_s1 = inlined_call_operand.vmem [shape: bf16[1,80,128], index: 1, kind: input, shape index: {}]   ;;  %s203_s0 = inlined_call_operand.vmem [shape: bf16[16,80], index: 0, kind: input, shape index: {}]   ;;  %s204_s2 = inlined_call_operand.vmem [shape: bf16[16,128], index: 2, kind: output, shape index: {}]  }
   0x1   :  { %142 = vmatprep.subr.bf16.mxu0 %v164_v0  ;;  %v158_v1 = vld [vmem:[%s202_s1] sm:$0xff]   ;;  %152 = vmatprep.mubr.msk.bf16.mxu0 %vm165_vm0, %v164_v0  ;;  %v159_v2 = vld [vmem:[%s202_s1 + $0x8] sm:$0xff]   ;;  %v160_v3 = vld [vmem:[%s202_s1 + $0x10] sm:$0xff]  }
   0x2   :  { %143 = vmatpush3.bf16.msra.mxu0 %v158_v1  ;;  %v161_v4 = vld [vmem:[%s202_s1 + $0x18] sm:$0xff]   ;;  %v162_v5 = vld [vmem:[%s202_s1 + $0x20] sm:$0xff]  }
   0x3   :  { %144 = vmatprep.subr.bf16.mxu0 %v164_v0  ;;  %v163_v6 = vld [vmem:[%s203_s0] sm:$0xff]  }
   0x6   :  { %145 = vmatpush3.bf16.msra.mxu0 %v159_v2 }
   0x7   :  { %146 = vmatprep.subr.bf16.mxu0 %v164_v0 }
   0xa   :  { %147 = vmatpush3.bf16.msra.mxu0 %v160_v3 }
   0xb   :  { %148 = vmatprep.subr.bf16.mxu0 %v164_v0 }
   0xe   :  { %149 = vmatpush3.bf16.msra.mxu0 %v161_v4 }
   0xf   :  { %150 = vmatprep.subr.bf16.mxu0 %v164_v0 }
  0x12   :  { %151 = vmatpush3.bf16.msra.mxu0 %v162_v5 }
  0x15   :  { %153 = vmatmul.mubr.msk.bf16.vlgmr.msra.gmra.mrb[0].mxu0 %vm59_vm1, %v163_v6 }
  0xe8   :  { %v97_v7 = vpop.f32.mrb[0].mxu0 }
  0xe9   :  { %v154_v8 = vpop.f32.mrb[1].mxu0  ;;  %v104_v10 = vmax.f32 %v97_v7, 0.0 }
  0xea   :  { %v100_v9 = vpop.f32.mrb[2].mxu0 }
  0xeb   :  { %v105_v11 = vmax.f32 %v100_v9, 0.0  ;;  %v155_v12 = vpop.f32.mrb[3].mxu0 }
  0xed   :  { %v134_v13 = vpack.c.bf16 %v105_v11, %v104_v10 }
  0xef   :  { %135 = vst [vmem:[%s204_s2] sm:$0xff] %v134_v13  }

// kernel: wikiart_part2_forward.7
= control target key start
LH: loop header
LB: loop body
LE: loop exit
PB: predicated region body
PF: predicated region fallthrough
CT: control target
= control target key end

     0   :  { %v243_v0 = vmov 0   ;;  %vm143_vm0 = vcmask 916480   ;;  %s316_s1 = inlined_call_operand.vmem [shape: bf16[1,240,128], index: 1, kind: input, shape index: {}]   ;;  %s317_s0 = inlined_call_operand.vmem [shape: bf16[16,240], index: 0, kind: input, shape index: {}]   ;;  %s318_s2 = inlined_call_operand.vmem [shape: f32[16,128], index: 2, kind: output, shape index: {}]  }
   0x1   :  { %147 = vmatprep.subr.bf16.mxu0 %v243_v0  ;;  %v221_v1 = vld [vmem:[%s316_s1] sm:$0xff]   ;;  %v222_v2 = vld [vmem:[%s316_s1 + $0x8] sm:$0xff]   ;;  %v223_v3 = vld [vmem:[%s316_s1 + $0x10] sm:$0xff]  }
   0x2   :  { %148 = vmatpush1.bf16.msra.mxu0 %v221_v1  ;;  %v224_v4 = vld [vmem:[%s316_s1 + $0x18] sm:$0xff]   ;;  %v225_v5 = vld [vmem:[%s316_s1 + $0x20] sm:$0xff]   ;;  %v226_v7 = vld [vmem:[%s316_s1 + $0x28] sm:$0xff]  }
   0x3   :  { %149 = vmatprep.subr.bf16.mxu0 %v243_v0  ;;  %v238_v6 = vld [vmem:[%s317_s0 + $0x4] ss:$8 sps:$4 sm:$0xff]   ;;  %v227_v8 = vld [vmem:[%s316_s1 + $0x30] sm:$0xff]   ;;  %v228_v9 = vld [vmem:[%s316_s1 + $0x38] sm:$0xff]  }
   0x4   :  { %219 = vmatprep.mubr.msk.bf16.mxu0 %vm143_vm0, %v238_v6  ;;  %v229_v10 = vld [vmem:[%s316_s1 + $0x40] sm:$0xff]   ;;  %v230_v11 = vld [vmem:[%s316_s1 + $0x48] sm:$0xff]   ;;  %v231_v12 = vld [vmem:[%s316_s1 + $0x50] sm:$0xff]  }
   0x5   :  { %v232_v13 = vld [vmem:[%s316_s1 + $0x58] sm:$0xff]   ;;  %v233_v14 = vld [vmem:[%s316_s1 + $0x60] sm:$0xff]   ;;  %v234_v15 = vld [vmem:[%s316_s1 + $0x68] sm:$0xff]  }
   0x6   :  { %150 = vmatpush1.bf16.msra.mxu0 %v222_v2  ;;  %v235_v16 = vld [vmem:[%s316_s1 + $0x70] sm:$0xff]   ;;  %v236_v17 = vld [vmem:[%s317_s0] ss:$8 sps:$4 sm:$0xff]  }
   0x7   :  { %151 = vmatprep.subr.bf16.mxu0 %v243_v0 }
   0xa   :  { %152 = vmatpush1.bf16.msra.mxu0 %v223_v3 }
   0xb   :  { %153 = vmatprep.subr.bf16.mxu0 %v243_v0 }
   0xe   :  { %154 = vmatpush1.bf16.msra.mxu0 %v224_v4 }
   0xf   :  { %155 = vmatprep.subr.bf16.mxu0 %v243_v0 }
  0x12   :  { %156 = vmatpush1.bf16.msra.mxu0 %v225_v5 }
  0x13   :  { %157 = vmatprep.subr.bf16.mxu0 %v243_v0 }
  0x16   :  { %158 = vmatpush1.bf16.msra.mxu0 %v226_v7 }
  0x17   :  { %159 = vmatprep.subr.bf16.mxu0 %v243_v0 }
  0x1a   :  { %160 = vmatpush1.bf16.msra.mxu0 %v227_v8 }
  0x1b   :  { %161 = vmatprep.subr.bf16.mxu0 %v243_v0 }
  0x1e   :  { %162 = vmatpush1.bf16.msra.mxu0 %v228_v9 }
  0x1f   :  { %163 = vmatprep.subr.bf16.mxu0 %v243_v0 }
  0x22   :  { %164 = vmatpush1.bf16.msra.mxu0 %v229_v10 }
  0x23   :  { %165 = vmatprep.subr.bf16.mxu0 %v243_v0 }
  0x26   :  { %166 = vmatpush1.bf16.msra.mxu0 %v230_v11 }
  0x27   :  { %167 = vmatprep.subr.bf16.mxu0 %v243_v0 }
  0x2a   :  { %168 = vmatpush1.bf16.msra.mxu0 %v231_v12 }
  0x2b   :  { %169 = vmatprep.subr.bf16.mxu0 %v243_v0 }
  0x2e   :  { %170 = vmatpush1.bf16.msra.mxu0 %v232_v13 }
  0x2f   :  { %171 = vmatprep.subr.bf16.mxu0 %v243_v0 }
  0x32   :  { %172 = vmatpush1.bf16.msra.mxu0 %v233_v14 }
  0x33   :  { %173 = vmatprep.subr.bf16.mxu0 %v243_v0 }
  0x36   :  { %174 = vmatpush1.bf16.msra.mxu0 %v234_v15 }
  0x37   :  { %175 = vmatprep.subr.bf16.mxu0 %v243_v0 }
  0x3a   :  { %176 = vmatpush1.bf16.msra.mxu0 %v235_v16 }
  0x3d   :  { %180 = vmatmul.mubr.bf16.vlgmr.msra.gmra.mrb[0].mxu0 %v236_v17 }
 0x110   :  { %v181_v18 = vpop.f32.mrb[0].mxu0 }
 0x111   :  { %v188_v19 = vmul.f32 0.5, %v181_v18  ;;  %v183_v20 = vpop.f32.mrb[1].mxu0 }
 0x112   :  { %v184_v21 = vpop.f32.mrb[2].mxu0 }
 0x113   :  { %239 = vtanh.f32 %v188_v19  ;;  %v189_v22 = vmul.f32 0.5, %v184_v21  ;;  %v186_v23 = vpop.f32.mrb[3].mxu0 }
 0x115   :  { %241 = vtanh.f32 %v189_v22 }
 0x11d   :  { %v240_v24 = vpop.eup %239 }
 0x11e   :  { %v192_v25 = vadd.f32 1.0, %v240_v24 }
 0x11f   :  { %v242_v26 = vpop.eup %241 }
 0x120   :  { %v194_v27 = vmul.f32 0.5, %v192_v25  ;;  %v193_v28 = vadd.f32 1.0, %v242_v26 }
 0x122   :  { %196 = vst [vmem:[%s318_s2] sm:$0xff] %v194_v27  ;;  %v195_v29 = vmul.f32 0.5, %v193_v28 }
 0x124   :  { %197 = vst [vmem:[%s318_s2 + $0x8] sm:$0xff] %v195_v29 }

</bundles_post_ra>
